<compile_context>
chip_gen: v6e
topology: v6e:2x2x1
jax: 0.10.0
libtpu: 0.0.40
codegen_flags: <defaults>
</compile_context>

<pallas_src>
import functools

import jax
import jax.numpy as jnp
from jax import lax
from jax.experimental import pallas as pl
from jax.experimental.pallas import tpu as pltpu


def _round_up(x, m):
    return (x + m - 1) // m * m


def _fused_conv_lora_kernel(band_ref, halo_ref, wa_ref, wb_ref, b_ref, o_ref):
    """One grid step = one image (grid axis 0) x one band of t output rows (axis 1).

    band_ref : (1, t, 2*(Wo+1), 2*Cin) bf16 -- row-pairs [r*t, (r+1)*t) of the
               halo-padded NHWC image; sublane m = s*(Wo+1)+wp holds padded row
               (2*pair + s), column-pair wp; lane cc = wsub*Cin + c holds padded
               column (2*wp + wsub), channel c.
    halo_ref : (1, 1, 2*(Wo+1), 2*Cin) bf16 -- row-pair (r+1)*t (only row 0 used).
    wa_ref   : (3, 2*Cin, Coutp) bf16       -- folded weight, taps (kh, kw=0|1).
    wb_ref   : (3,   Cin, Coutp) bf16       -- folded weight, taps (kh, kw=2).
    b_ref    : (1, Coutp) f32               -- folded bias ((1-alpha)*bias).
    o_ref    : (1, t, Wo, Cout) f32.
    """
    t = band_ref.shape[1]
    w2 = band_ref.shape[2] // 2          # Wo + 1 column pairs
    cin = band_ref.shape[3] // 2
    wo = o_ref.shape[2]
    cout = o_ref.shape[3]
    coutp = wa_ref.shape[2]
    m = t * wo

    band = band_ref[0]                   # (t, 2*w2, 2*cin) bf16
    halo = halo_ref[0]                   # (1, 2*w2, 2*cin) bf16

    rows0 = band[:, 0:w2, :]             # padded rows 2i       (kh = 0)
    rows1 = band[:, w2:2 * w2, :]        # padded rows 2i + 1   (kh = 1)
    halo0 = halo[:, 0:w2, :]             # padded row 2t (first row of halo pair)
    if t > 1:
        rows2 = jnp.concatenate([rows0[1:], halo0], axis=0)   # rows 2i + 2 (kh = 2)
    else:
        rows2 = halo0

    acc = jnp.zeros((m, coutp), jnp.float32)
    for kh, rows in enumerate((rows0, rows1, rows2)):
        # taps (kh, kw=0) and (kh, kw=1): columns 2j and 2j+1 live in one lane pair.
        lhs_a = rows[:, 0:wo, :].reshape(m, 2 * cin)
        # tap (kh, kw=2): column 2j+2 is the first half of the next column pair.
        lhs_b = rows[:, 1:w2, 0:cin].reshape(m, cin)
        acc += jnp.dot(lhs_a, wa_ref[kh], preferred_element_type=jnp.float32)
        acc += jnp.dot(lhs_b, wb_ref[kh], preferred_element_type=jnp.float32)

    acc = acc + b_ref[...]
    o_ref[0] = acc[:, 0:cout].reshape(t, wo, cout).astype(o_ref.dtype)


def _choose_t_oh(B, Ho, Wo, Cin, Cout, budget_bytes):
    """Largest divisor of Ho whose per-step tiles fit `budget_bytes` while keeping
    at least 2 grid steps (so v7x's two TensorCores both get work)."""
    coutp = _round_up(Cout, 128) if Cout >= 64 else Cout

    def step_bytes(t):
        band = 2 * t * 2 * (Wo + 1) * 2 * Cin * 2        # double-buffered, bf16
        halo = 2 * 2 * (Wo + 1) * 2 * Cin * 2
        outb = 2 * t * Wo * Cout * 4                     # double-buffered, f32
        live = 3 * t * Wo * coutp * 4                    # acc + dot operands
        return band + halo + outb + live

    best = 1
    for t in range(1, Ho + 1):
        if Ho % t:
            continue
        if B * (Ho // t) < 2 and B * Ho > 1:
            continue                                     # keep >= 2 grid steps
        if step_bytes(t) <= budget_bytes:
            best = t
    return best


@functools.partial(jax.jit, static_argnums=(5,), static_argnames=("alpha_lora",))
def downsample_weighted_lora(x_nchw, wproj, bproj, A_stack, WB_stack, task,
                             *, alpha_lora=1.0):
    """x_nchw: (B, Cin, H, W) f32. Returns (B, Cout, Ho, Wo) f32 (3x3, stride 2, pad 1)."""
    B, Cin, H, W = x_nchw.shape
    Cout = wproj.shape[0]
    Ho = (H - 1) // 2 + 1
    Wo = (W - 1) // 2 + 1
    n_active = int(task) + 1
    alpha = float(alpha_lora)

    # ---- fold LoRA + alpha + bias into one effective 3x3 conv weight (exact) ----
    wproj_hwco = jnp.transpose(wproj, (2, 3, 1, 0))                   # (3,3,Cin,Cout)
    a_t = jnp.transpose(A_stack[:n_active], (0, 2, 1))                # (T,Cin,rank)
    wb_t = jnp.transpose(WB_stack[:n_active], (0, 3, 4, 2, 1))        # (T,3,3,rank,Cout)
    w_lora = jnp.einsum("tcr,thwro->hwco", a_t, wb_t)                 # (3,3,Cin,Cout)
    w_eff = (1.0 - alpha) * wproj_hwco + alpha * w_lora               # f32
    b_eff = ((1.0 - alpha) * bproj).astype(jnp.float32)

    # Lane-pad the GEMM N dim only when it is worth it (gated for small Cout).
    Coutp = _round_up(Cout, 128) if Cout >= 64 else Cout
    if Coutp > Cout:
        w_eff = jnp.pad(w_eff, ((0, 0), (0, 0), (0, 0), (0, Coutp - Cout)))
        b_eff = jnp.pad(b_eff, (0, Coutp - Cout))
    wa = w_eff[:, 0:2].reshape(3, 2 * Cin, Coutp).astype(jnp.bfloat16)  # taps (kh,0|1)
    wb = w_eff[:, 2].reshape(3, Cin, Coutp).astype(jnp.bfloat16)        # taps (kh,2)
    b_eff = b_eff.reshape(1, Coutp)

    # ---- input prep: NHWC + halo pad + bf16 cast (one fused pass), free reshape ---
    # Padded size is 2*(Ho+1) rows x 2*(Wo+1) cols so the stride-2 taps fall on
    # row/column *pairs*; the reshape below is a pure row-major view change.
    x_nhwc = jnp.transpose(x_nchw, (0, 2, 3, 1))
    pad_b = 2 * Ho + 1 - H
    pad_r = 2 * Wo + 1 - W
    xp = jnp.pad(x_nhwc, ((0, 0), (1, pad_b), (1, pad_r), (0, 0))).astype(jnp.bfloat16)
    W2 = Wo + 1
    xr = xp.reshape(B, Ho + 1, 2 * W2, 2 * Cin)

    # ---- generation-aware VMEM limit + row-band tile selection ----
    try:
        vmem_cap = int(pltpu.get_tpu_info().vmem_capacity_bytes)
    except Exception:
        vmem_cap = 64 << 20                      # conservative (v7x-class) fallback
    if vmem_cap <= (64 << 20):                   # v7x: leave >= 8 MiB headroom
        vmem_limit = min(int(0.7 * vmem_cap), 56 << 20)
    else:                                        # v5e / v6e: 128 MiB physical
        vmem_limit = int(0.7 * vmem_cap)
    vmem_limit = max(vmem_limit, 16 << 20)

    t_oh = _choose_t_oh(B, Ho, Wo, Cin, Cout, budget_bytes=max(vmem_cap // 8, 4 << 20))
    R = Ho // t_oh

    out_nhwc = pl.pallas_call(
        _fused_conv_lora_kernel,
        out_shape=jax.ShapeDtypeStruct((B, Ho, Wo, Cout), jnp.float32),
        grid_spec=pltpu.PrefetchScalarGridSpec(
            num_scalar_prefetch=0,
            grid=(B, R),
            in_specs=[
                # main band: row-pairs [r*t_oh, (r+1)*t_oh)
                pl.BlockSpec((1, t_oh, 2 * W2, 2 * Cin), lambda b, r: (b, r, 0, 0)),
                # halo: row-pair (r+1)*t_oh (block size 1 -> block idx == pair idx)
                pl.BlockSpec((1, 1, 2 * W2, 2 * Cin),
                             lambda b, r: (b, (r + 1) * t_oh, 0, 0)),
                # folded weights / bias: tiny, constant-indexed, stay resident.
                # (pl.Buffered(1) single-buffering unnecessary: << 1% of VMEM here.)
                pl.BlockSpec((3, 2 * Cin, Coutp), lambda b, r: (0, 0, 0)),
                pl.BlockSpec((3, Cin, Coutp), lambda b, r: (0, 0, 0)),
                pl.BlockSpec((1, Coutp), lambda b, r: (0, 0)),
            ],
            out_specs=pl.BlockSpec((1, t_oh, Wo, Cout), lambda b, r: (b, r, 0, 0)),
        ),
        compiler_params=pltpu.CompilerParams(
            dimension_semantics=("parallel", "parallel"),
            vmem_limit_bytes=vmem_limit),
    )(xr, xr, wa, wb, b_eff)

    # Module contract is NCHW; single transpose pass (drop it if consumer is NHWC).
    return jnp.transpose(out_nhwc, (0, 3, 1, 2))


def _reference(x_nchw, wproj, bproj, A_stack, WB_stack, task, alpha_lora):
    """Pure-JAX (f32) reference mirroring the PyTorch forward."""
    dn = ("NCHW", "OIHW", "NCHW")
    out = lax.conv_general_dilated(x_nchw, wproj, (2, 2), [(1, 1), (1, 1)],
                                   dimension_numbers=dn)
    out = out + bproj[None, :, None, None]
    x_bhwc = jnp.transpose(x_nchw, (0, 2, 3, 1))
    sum_lora = jnp.zeros_like(out)
    for t in range(task + 1):
        a = jnp.einsum("bhwc,rc->bhwr", x_bhwc, A_stack[t])      # lora_A (no bias)
        a_nchw = jnp.transpose(a, (0, 3, 1, 2))
        sum_lora = sum_lora + lax.conv_general_dilated(
            a_nchw, WB_stack[t], (2, 2), [(1, 1), (1, 1)], dimension_numbers=dn)
    return (1.0 - alpha_lora) * out + alpha_lora * sum_lora


if __name__ == "__main__":
    # Small, deterministic test configuration.
    B, Cin, H, W = 2, 4, 16, 16
    Cout, rank, n_tasks = 8, 4, 3
    task = 1
    alpha_lora = 0.5

    key = jax.random.PRNGKey(0)
    kx, kw, kb, ka, kbl = jax.random.split(key, 5)
    x = jax.random.normal(kx, (B, Cin, H, W), jnp.float32)
    wproj = jax.random.normal(kw, (Cout, Cin, 3, 3), jnp.float32) * 0.1
    bproj = jax.random.normal(kb, (Cout,), jnp.float32) * 0.1
    A_stack = jax.random.normal(ka, (n_tasks, rank, Cin), jnp.float32) * 0.1
    WB_stack = jax.random.normal(kbl, (n_tasks, Cout, rank, 3, 3), jnp.float32) * 0.1

    out = downsample_weighted_lora(x, wproj, bproj, A_stack, WB_stack, task,
                                   alpha_lora=alpha_lora)
    out = jax.block_until_ready(out)

    ref = jax.block_until_ready(
        _reference(x, wproj, bproj, A_stack, WB_stack, task, alpha_lora))

    assert out.shape == (B, Cout, H // 2, W // 2), out.shape
    # bf16 GEMM inputs (f32 accumulate): tolerance loosened per review.
    assert jnp.allclose(out, ref, rtol=3e-2, atol=3e-2), \
        float(jnp.max(jnp.abs(out - ref)))
    print("KERNEL_OK")
</pallas_src>

<mosaic_0001>
module attributes {stable_mosaic.version = 11 : i64} {
  func.func @_fused_conv_lora_kernel(%arg0: i32, %arg1: i32, %arg2: memref<1x8x18x8xbf16, #tpu.memory_space<vmem>>, %arg3: memref<1x1x18x8xbf16, #tpu.memory_space<vmem>>, %arg4: memref<3x8x8xbf16, #tpu.memory_space<vmem>>, %arg5: memref<3x4x8xbf16, #tpu.memory_space<vmem>>, %arg6: memref<1x8xf32, #tpu.memory_space<vmem>>, %arg7: memref<1x8x8x8xf32, #tpu.memory_space<vmem>>) attributes {dimension_semantics = [#tpu.dimension_semantics<parallel>, #tpu.dimension_semantics<parallel>], iteration_bounds = array<i64: 2, 1>, scalar_prefetch = 0 : i64, scratch_operands = 0 : i64, tpu.core_type = #tpu.core_type<tc>, window_params = [{transform_indices = @transform_0, window_bounds = array<i64: 1, 8, 18, 8>}, {transform_indices = @transform_1, window_bounds = array<i64: 1, 1, 18, 8>}, {pipeline_mode = #tpu.pipeline_mode<synchronous>, transform_indices = @transform_2, window_bounds = array<i64: 3, 8, 8>}, {pipeline_mode = #tpu.pipeline_mode<synchronous>, transform_indices = @transform_3, window_bounds = array<i64: 3, 4, 8>}, {pipeline_mode = #tpu.pipeline_mode<synchronous>, transform_indices = @transform_4, window_bounds = array<i64: 1, 8>}, {transform_indices = @transform_5, window_bounds = array<i64: 1, 8, 8, 8>}]} {
    %c0 = arith.constant 0 : index
    %c0_0 = arith.constant 0 : index
    %c0_1 = arith.constant 0 : index
    %c0_2 = arith.constant 0 : index
    %0 = vector.load %arg2[%c0, %c0_0, %c0_1, %c0_2] : memref<1x8x18x8xbf16, #tpu.memory_space<vmem>>, vector<1x8x18x8xbf16>
    %1 = vector.shape_cast %0 : vector<1x8x18x8xbf16> to vector<8x18x8xbf16>
    %c0_3 = arith.constant 0 : index
    %c0_4 = arith.constant 0 : index
    %c0_5 = arith.constant 0 : index
    %c0_6 = arith.constant 0 : index
    %2 = vector.load %arg3[%c0_3, %c0_4, %c0_5, %c0_6] : memref<1x1x18x8xbf16, #tpu.memory_space<vmem>>, vector<1x1x18x8xbf16>
    %3 = vector.shape_cast %2 : vector<1x1x18x8xbf16> to vector<1x18x8xbf16>
    %4 = vector.extract_strided_slice %1 {offsets = [0, 0, 0], sizes = [8, 9, 8], strides = [1, 1, 1]} : vector<8x18x8xbf16> to vector<8x9x8xbf16>
    %5 = vector.extract_strided_slice %1 {offsets = [0, 9, 0], sizes = [8, 9, 8], strides = [1, 1, 1]} : vector<8x18x8xbf16> to vector<8x9x8xbf16>
    %6 = vector.extract_strided_slice %3 {offsets = [0, 0, 0], sizes = [1, 9, 8], strides = [1, 1, 1]} : vector<1x18x8xbf16> to vector<1x9x8xbf16>
    %7 = vector.extract_strided_slice %4 {offsets = [1, 0, 0], sizes = [7, 9, 8], strides = [1, 1, 1]} : vector<8x9x8xbf16> to vector<7x9x8xbf16>
    %8 = tpu.concatenate %7, %6 in 0 : vector<7x9x8xbf16>, vector<1x9x8xbf16> -> vector<8x9x8xbf16>
    %cst = arith.constant 0.000000e+00 : f32
    %9 = vector.broadcast %cst : f32 to vector<64x8xf32>
    %10 = vector.extract_strided_slice %4 {offsets = [0, 0, 0], sizes = [8, 8, 8], strides = [1, 1, 1]} : vector<8x9x8xbf16> to vector<8x8x8xbf16>
    %11 = vector.shape_cast %10 : vector<8x8x8xbf16> to vector<64x8xbf16>
    %12 = vector.extract_strided_slice %4 {offsets = [0, 1, 0], sizes = [8, 8, 4], strides = [1, 1, 1]} : vector<8x9x8xbf16> to vector<8x8x4xbf16>
    %13 = vector.shape_cast %12 : vector<8x8x4xbf16> to vector<64x4xbf16>
    %c0_7 = arith.constant 0 : index
    %c0_8 = arith.constant 0 : index
    %c0_9 = arith.constant 0 : index
    %14 = vector.load %arg4[%c0_7, %c0_8, %c0_9] : memref<3x8x8xbf16, #tpu.memory_space<vmem>>, vector<1x8x8xbf16>
    %15 = vector.shape_cast %14 : vector<1x8x8xbf16> to vector<8x8xbf16>
    %cst_10 = arith.constant dense<0.000000e+00> : vector<64x8xf32>
    %16 = tpu.matmul %11, %15, %cst_10 {dimension_numbers = #tpu.dot_dimension_numbers<[1], [0], [0], [1], [0, 0, 1, 1], [], []>} : vector<64x8xbf16>, vector<8x8xbf16>, vector<64x8xf32> -> vector<64x8xf32>
    %17 = arith.addf %9, %16 : vector<64x8xf32>
    %c0_11 = arith.constant 0 : index
    %c0_12 = arith.constant 0 : index
    %c0_13 = arith.constant 0 : index
    %18 = vector.load %arg5[%c0_11, %c0_12, %c0_13] : memref<3x4x8xbf16, #tpu.memory_space<vmem>>, vector<1x4x8xbf16>
    %19 = vector.shape_cast %18 : vector<1x4x8xbf16> to vector<4x8xbf16>
    %cst_14 = arith.constant dense<0.000000e+00> : vector<64x8xf32>
    %20 = tpu.matmul %13, %19, %cst_14 {dimension_numbers = #tpu.dot_dimension_numbers<[1], [0], [0], [1], [0, 0, 1, 1], [], []>} : vector<64x4xbf16>, vector<4x8xbf16>, vector<64x8xf32> -> vector<64x8xf32>
    %21 = arith.addf %17, %20 : vector<64x8xf32>
    %22 = vector.extract_strided_slice %5 {offsets = [0, 0, 0], sizes = [8, 8, 8], strides = [1, 1, 1]} : vector<8x9x8xbf16> to vector<8x8x8xbf16>
    %23 = vector.shape_cast %22 : vector<8x8x8xbf16> to vector<64x8xbf16>
    %24 = vector.extract_strided_slice %5 {offsets = [0, 1, 0], sizes = [8, 8, 4], strides = [1, 1, 1]} : vector<8x9x8xbf16> to vector<8x8x4xbf16>
    %25 = vector.shape_cast %24 : vector<8x8x4xbf16> to vector<64x4xbf16>
    %c1 = arith.constant 1 : index
    %c0_15 = arith.constant 0 : index
    %c0_16 = arith.constant 0 : index
    %26 = vector.load %arg4[%c1, %c0_15, %c0_16] : memref<3x8x8xbf16, #tpu.memory_space<vmem>>, vector<1x8x8xbf16>
    %27 = vector.shape_cast %26 : vector<1x8x8xbf16> to vector<8x8xbf16>
    %cst_17 = arith.constant dense<0.000000e+00> : vector<64x8xf32>
    %28 = tpu.matmul %23, %27, %cst_17 {dimension_numbers = #tpu.dot_dimension_numbers<[1], [0], [0], [1], [0, 0, 1, 1], [], []>} : vector<64x8xbf16>, vector<8x8xbf16>, vector<64x8xf32> -> vector<64x8xf32>
    %29 = arith.addf %21, %28 : vector<64x8xf32>
    %c1_18 = arith.constant 1 : index
    %c0_19 = arith.constant 0 : index
    %c0_20 = arith.constant 0 : index
    %30 = vector.load %arg5[%c1_18, %c0_19, %c0_20] : memref<3x4x8xbf16, #tpu.memory_space<vmem>>, vector<1x4x8xbf16>
    %31 = vector.shape_cast %30 : vector<1x4x8xbf16> to vector<4x8xbf16>
    %cst_21 = arith.constant dense<0.000000e+00> : vector<64x8xf32>
    %32 = tpu.matmul %25, %31, %cst_21 {dimension_numbers = #tpu.dot_dimension_numbers<[1], [0], [0], [1], [0, 0, 1, 1], [], []>} : vector<64x4xbf16>, vector<4x8xbf16>, vector<64x8xf32> -> vector<64x8xf32>
    %33 = arith.addf %29, %32 : vector<64x8xf32>
    %34 = vector.extract_strided_slice %8 {offsets = [0, 0, 0], sizes = [8, 8, 8], strides = [1, 1, 1]} : vector<8x9x8xbf16> to vector<8x8x8xbf16>
    %35 = vector.shape_cast %34 : vector<8x8x8xbf16> to vector<64x8xbf16>
    %36 = vector.extract_strided_slice %8 {offsets = [0, 1, 0], sizes = [8, 8, 4], strides = [1, 1, 1]} : vector<8x9x8xbf16> to vector<8x8x4xbf16>
    %37 = vector.shape_cast %36 : vector<8x8x4xbf16> to vector<64x4xbf16>
    %c2 = arith.constant 2 : index
    %c0_22 = arith.constant 0 : index
    %c0_23 = arith.constant 0 : index
    %38 = vector.load %arg4[%c2, %c0_22, %c0_23] : memref<3x8x8xbf16, #tpu.memory_space<vmem>>, vector<1x8x8xbf16>
    %39 = vector.shape_cast %38 : vector<1x8x8xbf16> to vector<8x8xbf16>
    %cst_24 = arith.constant dense<0.000000e+00> : vector<64x8xf32>
    %40 = tpu.matmul %35, %39, %cst_24 {dimension_numbers = #tpu.dot_dimension_numbers<[1], [0], [0], [1], [0, 0, 1, 1], [], []>} : vector<64x8xbf16>, vector<8x8xbf16>, vector<64x8xf32> -> vector<64x8xf32>
    %41 = arith.addf %33, %40 : vector<64x8xf32>
    %c2_25 = arith.constant 2 : index
    %c0_26 = arith.constant 0 : index
    %c0_27 = arith.constant 0 : index
    %42 = vector.load %arg5[%c2_25, %c0_26, %c0_27] : memref<3x4x8xbf16, #tpu.memory_space<vmem>>, vector<1x4x8xbf16>
    %43 = vector.shape_cast %42 : vector<1x4x8xbf16> to vector<4x8xbf16>
    %cst_28 = arith.constant dense<0.000000e+00> : vector<64x8xf32>
    %44 = tpu.matmul %37, %43, %cst_28 {dimension_numbers = #tpu.dot_dimension_numbers<[1], [0], [0], [1], [0, 0, 1, 1], [], []>} : vector<64x4xbf16>, vector<4x8xbf16>, vector<64x8xf32> -> vector<64x8xf32>
    %45 = arith.addf %41, %44 : vector<64x8xf32>
    %c0_29 = arith.constant 0 : index
    %c0_30 = arith.constant 0 : index
    %46 = vector.load %arg6[%c0_29, %c0_30] : memref<1x8xf32, #tpu.memory_space<vmem>>, vector<1x8xf32>
    %47 = vector.broadcast %46 : vector<1x8xf32> to vector<64x8xf32>
    %48 = arith.addf %45, %47 : vector<64x8xf32>
    %49 = vector.shape_cast %48 : vector<64x8xf32> to vector<8x8x8xf32>
    %c0_31 = arith.constant 0 : index
    %c0_32 = arith.constant 0 : index
    %c0_33 = arith.constant 0 : index
    %c0_34 = arith.constant 0 : index
    %50 = vector.load %arg7[%c0_31, %c0_32, %c0_33, %c0_34] : memref<1x8x8x8xf32, #tpu.memory_space<vmem>>, vector<1x8x8x8xf32>
    %51 = vector.shape_cast %50 : vector<1x8x8x8xf32> to vector<8x8x8xf32>
    %52 = vector.shape_cast %49 : vector<8x8x8xf32> to vector<1x8x8x8xf32>
    tpu.vector_store %arg7[%c0_31, %c0_32, %c0_33, %c0_34], %52 {strides = array<i32>} : memref<1x8x8x8xf32, #tpu.memory_space<vmem>>, vector<1x8x8x8xf32>,
    return
  }
  func.func @transform_0(%arg0: i32, %arg1: i32) -> (i32, i32, i32, i32) {
    %c0_i32 = arith.constant 0 : i32
    %c0_i32_0 = arith.constant 0 : i32
    %c0_i32_1 = arith.constant 0 : i32
    return %arg0, %arg1, %c0_i32, %c0_i32_0 : i32, i32, i32, i32
  }
  func.func @transform_1(%arg0: i32, %arg1: i32) -> (i32, i32, i32, i32) {
    %c1_i32 = arith.constant 1 : i32
    %0 = arith.addi %arg1, %c1_i32 : i32
    %c8_i32 = arith.constant 8 : i32
    %1 = arith.muli %0, %c8_i32 : i32
    %c0_i32 = arith.constant 0 : i32
    %c0_i32_0 = arith.constant 0 : i32
    %c0_i32_1 = arith.constant 0 : i32
    return %arg0, %1, %c0_i32, %c0_i32_0 : i32, i32, i32, i32
  }
  func.func @transform_2(%arg0: i32, %arg1: i32) -> (i32, i32, i32) {
    %c0_i32 = arith.constant 0 : i32
    %c0_i32_0 = arith.constant 0 : i32
    %c0_i32_1 = arith.constant 0 : i32
    %c0_i32_2 = arith.constant 0 : i32
    return %c0_i32, %c0_i32_0, %c0_i32_1 : i32, i32, i32
  }
  func.func @transform_3(%arg0: i32, %arg1: i32) -> (i32, i32, i32) {
    %c0_i32 = arith.constant 0 : i32
    %c0_i32_0 = arith.constant 0 : i32
    %c0_i32_1 = arith.constant 0 : i32
    %c0_i32_2 = arith.constant 0 : i32
    return %c0_i32, %c0_i32_0, %c0_i32_1 : i32, i32, i32
  }
  func.func @transform_4(%arg0: i32, %arg1: i32) -> (i32, i32) {
    %c0_i32 = arith.constant 0 : i32
    %c0_i32_0 = arith.constant 0 : i32
    %c0_i32_1 = arith.constant 0 : i32
    return %c0_i32, %c0_i32_0 : i32, i32
  }
  func.func @transform_5(%arg0: i32, %arg1: i32) -> (i32, i32, i32, i32) {
    %c0_i32 = arith.constant 0 : i32
    %c0_i32_0 = arith.constant 0 : i32
    %c0_i32_1 = arith.constant 0 : i32
    return %arg0, %arg1, %c0_i32, %c0_i32_0 : i32, i32, i32, i32
  }
}

</mosaic_0001>

<bundles_post_ra>
// kernel: downsample_weighted_lora.1
= control target key start
LH: loop header
LB: loop body
LE: loop exit
PB: predicated region body
PF: predicated region fallthrough
CT: control target
= control target key end

     0   :  { %s1613_s18 = smov 0   ;;  %s1615_s19 = smov 0   ;;  %s2002_s0 = inlined_call_operand.vmem [shape: bf16[2,9,18,8], index: 0, kind: input, shape index: {}, may-alias: {0,1}]   ;;  %s2003_s1 = inlined_call_operand.vmem [shape: bf16[2,9,18,8], index: 1, kind: input, shape index: {}, may-alias: {0,1}]   ;;  %s2004_s2 = inlined_call_operand.vmem [shape: bf16[3,8,8], index: 2, kind: input, shape index: {}]   ;;  %s2005_s3 = inlined_call_operand.vmem [shape: bf16[3,4,8], index: 3, kind: input, shape index: {}]   ;;  %s2006_s4 = inlined_call_operand.vmem [shape: f32[1,8], index: 4, kind: input, shape index: {}]   ;;  %s2007_s5 = inlined_call_operand.vmem [shape: f32[2,8,8,8], index: 5, kind: output, shape index: {}]  }
   0x1   :  { %s1617_s20 = smov 0  }
   0x2 LB: > { %s27_s21 = sadd.s32 1, %s1577_s19  ;;  %p1358_p0 = scmp.ge.s32.totalorder %s1581_s20, 1  ;;  %s1581_s20 = sphi %s1617_s20, %s15_s20   ;;  %s1577_s19 = sphi %s1615_s19, %s2013_s19   ;;  %s1573_s18 = sphi %s1613_s18, %s2012_s18  }
   0x3   : > { %p29_p1 = scmp.ge.s32.totalorder %s27_s21, 2  ;;  %p243_p2 = scmp.lt.s32.totalorder %s1581_s20, 3 }
   0x5   : > { %s2015_s21 = smov (%p29_p1, %s27_s21), 0  ;;  %p244_p3 = pnand %p1358_p0, %p243_p2 }
   0x6   : > { %p302_p4 = scmp.lt.s32.totalorder (!%p244_p3), %s1573_s18, 1 }
   0x7   : > { %247 = sbr.rel (%p244_p3) target bundleno = 289 (0x121), region = 40 }
   0xc   : > { %v482_v0 = vld [vmem:[%s2004_s2] sm:$0xf]  ;;  %vm611_vm0 = vcmask 1043456   ;;  %vm509_vm1 = vcmask 1041408   ;;  %v1387_v4 = vld [vmem:[%s2004_s2 + $0x4] sm:$0xf] }
   0xd   : > { %v483_v1 = vld [vmem:[%s2005_s3] sm:$0x3]  ;;  %1520 = vmatprep.subr.msk.bf16.mxu1 %vm611_vm0, %v482_v0  ;;  %v613_v2 = vsel %vm611_vm0, %v482_v0, 0  ;;  %s2017_s18 = smov (!%p302_p4, %s1573_s18), 1  ;;  %v1396_v5 = vld [vmem:[%s2005_s3 + $0x2] sm:$0x3] }
   0xe   : > { %1519 = vmatprep.subr.msk.bf16.mxu0 %vm509_vm1, %v483_v1  ;;  %v511_v3 = vsel %vm509_vm1, %v483_v1, 0  ;;  %1470 = vmatpush3.bf16.msra.mxu1 %v613_v2  ;;  %s1525_s30 = smul.u32 108, %s2017_s18  ;;  %vm598_vm2 = vcmask 64512   ;;  %vm367_vm3 = vsmask.f32 3328  ;;  %v940_v17 = vsel %vm509_vm1, %v1396_v5, 0 }
   0xf   : > { %1460 = vmatpush3.bf16.msra.mxu0 %v511_v3  ;;  %1522 = vmatprep.subr.msk.bf16.mxu1 %vm509_vm1, %v1396_v5  ;;  %vm368_vm4 = vsmask.f32 7440  ;;  %vm496_vm5 = vcmask 31744   ;;  %v1686_v22 = vsel %vm611_vm0, %v1387_v4, 0  ;;  %v1691_v23 = vld [vmem:[%s2005_s3 + $0x4] sm:$0x3] }
  0x10   : > { %1521 = vmatprep.subr.msk.bf16.mxu0 %vm611_vm0, %v1387_v4  ;;  %s1657_s8 = scalar_lea.vmem %s2002_s0, %s1525_s30  ;;  %vm1700_vm6 = vmor %vm367_vm3, %vm368_vm4  ;;  %vm776_vm7 = vcmask 1042432   ;;  %vm777_vm8 = vcmask 1046532   ;;  %s1427_s13 = sadd.s32 96, %s1525_s30 }
  0x11   : > { %v341_v6 = vld [vmem:[%s1657_s8] sm:$0xf]  ;;  %v1661_v7 = vld [vmem:[%s1657_s8 + $0xc] sm:$0xf]  ;;  %v1664_v8 = vld [vmem:[%s1657_s8 + $0x18] sm:$0xf]  ;;  %s327_s16 = scalar_lea.vmem %s2003_s1, %s1427_s13 }
  0x12   : > { %v371_v9 = vshrl.u32 %v341_v6, 16  ;;  %v374_v10 = vshll.u32 %v341_v6, 16  ;;  %v385_v11 = vshrl.u32 %v1661_v7, 16  ;;  %v388_v12 = vshll.u32 %v1661_v7, 16  ;;  %v1669_v13 = vld [vmem:[%s1657_s8 + $0x24] sm:$0xf]  ;;  %vm1835_vm9 = vmor %vm776_vm7, %vm777_vm8 }
  0x13   : > { %v1371_v14 = vcombine.low %v341_v6, %v1661_v7  ;;  %v1372_v15 = vcombine.low %v1664_v8, %v1669_v13  ;;  %v1675_v16 = vld [vmem:[%s1657_s8 + $0x4] sm:$0xf]  ;;  %v1679_v20 = vld [vmem:[%s1657_s8 + $0x10] sm:$0xf]  ;;  %v1682_v21 = vld [vmem:[%s1657_s8 + $0x1c] sm:$0xf] }
  0x14   : > { %v373_v18 = vrot.slane %v371_v9, 4  ;;  %v376_v19 = vrot.slane %v374_v10, 5  ;;  %v380_v25 = vshll.u32 %v1675_v16, 16  ;;  %v387_v26 = vrot.slane %v385_v11, 4  ;;  %v1696_v28 = vld [vmem:[%s1657_s8 + $0x28] sm:$0xf] }
  0x15   : > { %1471 = vmatprep.mubr.msk.bf16.mxu1 %vm598_vm2, %v1371_v14  ;;  %v390_v27 = vrot.slane %v388_v12, 5  ;;  %v394_v30 = vshll.u32 %v1679_v20, 16  ;;  %v399_v31 = vshrl.u32 %v1664_v8, 16  ;;  %v402_v32 = vshll.u32 %v1664_v8, 16  ;;  %v1709_v34 = vld [vmem:[%s1657_s8 + $0x30] sm:$0xf] }
  0x16   : > { %1472 = vmatmul.mubr.msk.bf16.vlgmr.msra.gmra.mxu1 %vm598_vm2, %v1372_v15  ;;  %v377_v24 = vor.u32 %v376_v19, %v373_v18  ;;  %v408_v33 = vshll.u32 %v1682_v21, 16  ;;  %v382_v36 = vrot.slane %v380_v25, 5  ;;  %v413_v38 = vshrl.u32 %v1669_v13, 16  ;;  %v1715_v39 = vld [vmem:[%s1657_s8 + $0x34] sm:$0xf]  ;;  %s1428_s17 = sshll.u32 %s2017_s18, 6 }
  0x17   : > { %1490 = vmatpush3.bf16.msra.mxu1 %v940_v17  ;;  %v391_v37 = vor.u32 %v390_v27, %v387_v26  ;;  %v396_v40 = vrot.slane %v394_v30, 5  ;;  %v401_v41 = vrot.slane %v399_v31, 4  ;;  %v404_v42 = vrot.slane %v402_v32, 5  ;;  %v1733_v0 = vld [vmem:[%s1657_s8 + $0x20] sm:$0x1]  ;;  %s1974_s26 = scalar_lea.vmem %s2007_s5, %s1428_s17 }
  0x18   : > { %v378_v35 = vrot.slane %v377_v24, 4  ;;  %1524 = vmatprep.subr.msk.bf16.mxu1 %vm509_vm1, %v1691_v23  ;;  %v410_v43 = vrot.slane %v408_v33, 5  ;;  %v415_v46 = vrot.slane %v413_v38, 4  ;;  %v416_v47 = vshll.u32 %v1669_v13, 16  ;;  %v1742_v5 = vld [vmem:[%s1657_s8 + $0x2c] sm:$0x1] }
  0x19   : > { %v392_v45 = vrot.slane %v391_v37, 4  ;;  %v405_v48 = vor.u32 %v404_v42, %v401_v41  ;;  %v422_v49 = vshll.u32 %v1696_v28, 16  ;;  %v427_v50 = vshrl.u32 %v1709_v34, 16  ;;  %v1761_v31 = vld [vmem:[%s1657_s8 + $0x3c] sm:$0xf] }
  0x1a   : > { %v383_v44 = vsel %vm1700_vm6, %v378_v35, %v382_v36  ;;  %v430_v51 = vshll.u32 %v1709_v34, 16  ;;  %v418_v53 = vrot.slane %v416_v47, 5  ;;  %v436_v54 = vshll.u32 %v1715_v39, 16  ;;  %v1778_v37 = vld [vmem:[%s2004_s2 + $0x8] sm:$0xf] }
  0x1b   : > { %v1725_v52 = vsel %vm1700_vm6, %v392_v45, %v396_v40  ;;  %v680_v55 = vshrl.u32 %v1675_v16, 16  ;;  %v406_v56 = vrot.slane %v405_v48, 4  ;;  %v424_v57 = vrot.slane %v422_v49, 5 }
  0x1c   : > { %v429_v58 = vrot.slane %v427_v50, 4  ;;  %v432_v59 = vrot.slane %v430_v51, 5  ;;  %v419_v60 = vor.u32 %v418_v53, %v415_v46  ;;  %v1729_v61 = vrot.slane %v436_v54, 5  ;;  %v1803_v50 = vld [vmem:[%s1657_s8 + $0x40] sm:$0xf] }
  0x1d   : > { %v1363_v62 = vcombine.low %v383_v44, %v1725_v52  ;;  %v682_v63 = vrot.slane %v680_v55, 4  ;;  %v1737_v1 = vsel %vm1700_vm6, %v406_v56, %v410_v43  ;;  %v690_v3 = vshrl.u32 %v1679_v20, 16  ;;  %v1818_v54 = vld [vmem:[%s1657_s8 + $0x58] sm:$0xf] }
  0x1e   : > { %v433_v2 = vor.u32 %v432_v59, %v429_v58  ;;  %v700_v4 = vshrl.u32 %v1682_v21, 16  ;;  %v420_v6 = vrot.slane %v419_v60, 4  ;;  %v706_v10 = vshll.u32 %v1733_v0, 16  ;;  %v343_v59 = vld [vmem:[%s1657_s8 + $0x8] sm:$0x1] }
  0x1f   : > { %1461 = vmatprep.mubr.msk.bf16.mxu0 %vm496_vm5, %v1363_v62  ;;  %v683_v9 = vor.u32 %v682_v63, %v382_v36  ;;  %v710_v11 = vshrl.u32 %v1696_v28, 16  ;;  %v692_v14 = vrot.slane %v690_v3, 4  ;;  %v716_v17 = vshll.u32 %v1742_v5, 16  ;;  %v1773_v36 = vld [vmem:[%s1657_s8 + $0x48] sm:$0xf] }
  0x20   : > { %v434_v12 = vrot.slane %v433_v2, 4  ;;  %v702_v15 = vrot.slane %v700_v4, 4  ;;  %v1750_v18 = vsel %vm1700_vm6, %v420_v6, %v424_v57  ;;  %v1754_v24 = vsel %vm509_vm1, %v1691_v23, 0  ;;  %v346_v3 = vld [vmem:[%s1657_s8 + $0x14] sm:$0x1] }
  0x21   : > { %v712_v19 = vrot.slane %v710_v11, 4  ;;  %v1364_v25 = vcombine.low %v1737_v1, %v1750_v18  ;;  %v1758_v26 = vrot.slane %v683_v9, 4  ;;  %v693_v27 = vor.u32 %v692_v14, %v396_v40 }
  0x22   : > { %v703_v30 = vor.u32 %v702_v15, %v410_v43  ;;  %v1766_v32 = vsel %vm1700_vm6, %v434_v12, %v1729_v61  ;;  %v1768_v33 = vrot.slane %v706_v10, 5  ;;  %v1770_v23 = vrot.slane %v716_v17, 5  ;;  %v1788_v43 = vld [vmem:[%s1657_s8 + $0x54] sm:$0xf] }
  0x23   : > { %v713_v35 = vor.u32 %v712_v19, %v424_v57  ;;  %v1780_v38 = vrot.slane %v693_v27, 4  ;;  %v1379_v41 = vrot.slane %v1675_v16, 9  ;;  %v1380_v42 = vrot.slane %v1679_v20, 9  ;;  %1462 = vmatmul.mubr.msk.bf16.vlgmr.msra.gmra.mxu0 %vm496_vm5, %v1364_v25 }
  0x24   : > { %v1782_v40 = vrot.slane %v703_v30, 4  ;;  %v1381_v45 = vrot.slane %v1682_v21, 9  ;;  %v1382_v46 = vrot.slane %v1696_v28, 9  ;;  %1480 = vmatpush3.bf16.msra.mxu0 %v1686_v22  ;;  %v441_v47 = vshrl.u32 %v1761_v31, 16  ;;  %v1806_v21 = vld [vmem:[%s1657_s8 + $0x4c] sm:$0xf] }
  0x25   : > { %v1790_v44 = vrot.slane %v713_v35, 4  ;;  %v1415_v16 = vcombine.low %v1725_v52, %v1737_v1  ;;  %v444_v20 = vshll.u32 %v1761_v31, 16  ;;  %v1373_v48 = vcombine.low %v1709_v34, %v1761_v31  ;;  %1523 = vmatprep.subr.msk.bf16.mxu0 %vm611_vm0, %v1778_v37 }
  0x26   : > { %v455_v49 = vshrl.u32 %v1773_v36, 16  ;;  %v709_v22 = vsel %vm1700_vm6, %v1782_v40, %v1768_v33  ;;  %v458_v28 = vshll.u32 %v1773_v36, 16  ;;  %v469_v51 = vshrl.u32 %v1788_v43, 16 }
  0x27   : > { %v472_v53 = vshll.u32 %v1788_v43, 16  ;;  %v719_v55 = vsel %vm1700_vm6, %v1790_v44, %v1770_v23  ;;  %1475 = vmatprep.mubr.msk.bf16.mxu1 %vm598_vm2, %v1373_v48  ;;  %v1374_v56 = vcombine.low %v1773_v36, %v1788_v43  ;;  %v443_v57 = vrot.slane %v441_v47, 4  ;;  %v365_v44 = vld [vmem:[%s327_s16] sm:$0xf] }
  0x28   : > { %v446_v58 = vrot.slane %v444_v20, 5  ;;  %v450_v60 = vshll.u32 %v1803_v50, 16  ;;  %v457_v62 = vrot.slane %v455_v49, 4  ;;  %v460_v63 = vrot.slane %v458_v28, 5 }
  0x29   : > { %v464_v2 = vshll.u32 %v1806_v21, 16  ;;  %1476 = vmatmul.mubr.msk.bf16.gmra.mxu1 %vm598_vm2, %v1374_v56  ;;  %v471_v6 = vrot.slane %v469_v51, 4  ;;  %v474_v9 = vrot.slane %v472_v53, 5  ;;  %v478_v10 = vshll.u32 %v1818_v54, 16  ;;  %v355_v56 = vld [vmem:[%s1657_s8 + $0x38] sm:$0x1] }
  0x2a   : > { %v447_v4 = vor.u32 %v446_v58, %v443_v57  ;;  %v1839_v12 = vrot.slane %v450_v60, 5  ;;  %v461_v14 = vor.u32 %v460_v63, %v457_v62  ;;  %v781_v17 = vrot.slane %v343_v59, 5  ;;  %v358_v58 = vld [vmem:[%s1657_s8 + $0x44] sm:$0x1]  ;;  %v361_v63 = vld [vmem:[%s1657_s8 + $0x50] sm:$0x1] }
  0x2b   : > { %v1841_v15 = vrot.slane %v464_v2, 5  ;;  %v475_v25 = vor.u32 %v474_v9, %v471_v6  ;;  %v1843_v27 = vrot.slane %v478_v10, 5  ;;  %v785_v30 = vrot.slane %v346_v3, 5  ;;  %v364_v9 = vld [vmem:[%s1657_s8 + $0x5c] sm:$0x1] }
  0x2c   : > { %v448_v19 = vrot.slane %v447_v4, 4  ;;  %v462_v35 = vrot.slane %v461_v14, 4  ;;  %v782_v47 = vsel %vm1835_vm9, %v1379_v41, %v781_v17  ;;  %v789_v20 = vrot.slane %v1733_v0, 5 }
  0x2d   : > { %v793_v48 = vrot.slane %v1742_v5, 5  ;;  %v476_v28 = vrot.slane %v475_v25, 4  ;;  %v786_v51 = vsel %vm1835_vm9, %v1380_v42, %v785_v30  ;;  %v686_v53 = vshll.u32 %v343_v59, 16 }
  0x2e   : > { %v1852_v49 = vsel %vm1700_vm6, %v448_v19, %v1839_v12  ;;  %v1862_v0 = vsel %vm1700_vm6, %v462_v35, %v1841_v15  ;;  %v1397_v5 = vcombine.low %v782_v47, %v786_v51  ;;  %v790_v41 = vsel %vm1835_vm9, %v1381_v45, %v789_v20 }
  0x2f   : > { %v1365_v57 = vcombine.low %v1766_v32, %v1852_v49  ;;  %v1870_v42 = vsel %vm1700_vm6, %v476_v28, %v1843_v27  ;;  %v794_v59 = vsel %vm1835_vm9, %v1382_v46, %v793_v48  ;;  %v688_v60 = vrot.slane %v686_v53, 5 }
  0x30   : > { %v696_v62 = vshll.u32 %v346_v3, 16  ;;  %v1366_v2 = vcombine.low %v1862_v0, %v1870_v42  ;;  %1491 = vmatprep.mubr.msk.bf16.mxu1 %vm496_vm5, %v1397_v5  ;;  %v1398_v45 = vcombine.low %v790_v41, %v794_v59  ;;  %v1383_v4 = vrot.slane %v1715_v39, 9 }
  0x31   : > { %1465 = vmatprep.mubr.msk.bf16.mxu0 %vm496_vm5, %v1365_v57  ;;  %v797_v6 = vrot.slane %v355_v56, 5  ;;  %v689_v10 = vsel %vm1700_vm6, %v1758_v26, %v688_v60  ;;  %v1384_v3 = vrot.slane %v1803_v50, 9  ;;  %v801_v14 = vrot.slane %v358_v58, 5 }
  0x32   : > { %v698_v46 = vrot.slane %v696_v62, 5  ;;  %1466 = vmatmul.mubr.msk.bf16.gmra.mxu0 %vm496_vm5, %v1366_v2  ;;  %1492 = vmatmul.mubr.msk.bf16.vlgmr.msra.gmra.mxu1 %vm496_vm5, %v1398_v45  ;;  %v1385_v19 = vrot.slane %v1806_v21, 9  ;;  %v805_v25 = vrot.slane %v361_v63, 5  ;;  %v1386_v30 = vrot.slane %v1818_v54, 9 }
  0x33   : > { %v798_v17 = vsel %vm1835_vm9, %v1383_v4, %v797_v6  ;;  %1510 = vmatpush3.bf16.msra.mxu1 %v1754_v24  ;;  %v802_v35 = vsel %vm1835_vm9, %v1384_v3, %v801_v14  ;;  %v809_v47 = vrot.slane %v364_v9, 5  ;;  %v720_v20 = vshrl.u32 %v1715_v39, 16 }
  0x34   : > { %v699_v26 = vsel %vm1700_vm6, %v1780_v38, %v698_v46  ;;  %v1399_v28 = vcombine.low %v798_v17, %v802_v35  ;;  %v806_v51 = vsel %vm1835_vm9, %v1385_v19, %v805_v25  ;;  %v726_v53 = vshll.u32 %v355_v56, 16 }
  0x35   : > { %v1388_v48 = vcombine.low %v689_v10, %v699_v26  ;;  %v810_v38 = vsel %vm1835_vm9, %v1386_v30, %v809_v47  ;;  %v722_v24 = vrot.slane %v720_v20, 4  ;;  %v730_v57 = vshrl.u32 %v1803_v50, 16 }
  0x36   : > { %v736_v5 = vshll.u32 %v358_v58, 16  ;;  %v1389_v39 = vcombine.low %v709_v22, %v719_v55  ;;  %1495 = vmatprep.mubr.msk.bf16.mxu1 %vm496_vm5, %v1399_v28  ;;  %v1400_v11 = vcombine.low %v806_v51, %v810_v38  ;;  %v740_v56 = vshrl.u32 %v1806_v21, 16  ;;  %v366_v55 = vld [vmem:[%s327_s16 + $0x4] sm:$0xf] }
  0x37   : > { %1481 = vmatprep.mubr.msk.bf16.mxu0 %vm598_vm2, %v1388_v48  ;;  %v746_v50 = vshll.u32 %v361_v63, 16  ;;  %v723_v41 = vor.u32 %v722_v24, %v1729_v61  ;;  %v728_v58 = vrot.slane %v726_v53, 5  ;;  %v732_v59 = vrot.slane %v730_v57, 4 }
  0x38   : > { %v750_v23 = vshrl.u32 %v1818_v54, 16  ;;  %v1050_v60 = vsel %vm611_vm0, %v1778_v37, 0  ;;  %v738_v33 = vrot.slane %v736_v5, 5  ;;  %v742_v40 = vrot.slane %v740_v56, 4 }
  0x39   : > { %v756_v22 = vshll.u32 %v364_v9, 16  ;;  %v724_v62 = vrot.slane %v723_v41, 4  ;;  %v733_v2 = vor.u32 %v732_v59, %v1839_v12  ;;  %v748_v45 = vrot.slane %v746_v50, 5 }
  0x3a   : > { %v752_v21 = vrot.slane %v750_v23, 4  ;;  %1482 = vmatmul.mubr.msk.bf16.vlgmr.msra.gmra.mxu0 %vm598_vm2, %v1389_v39  ;;  %1496 = vmatmul.mubr.msk.bf16.gmra.mxu1 %vm496_vm5, %v1400_v11  ;;  %v743_v61 = vor.u32 %v742_v40, %v1841_v15  ;;  %v1016_v63 = vshrl.u32 %v365_v44, 16  ;;  %v1019_v4 = vshll.u32 %v365_v44, 16 }
  0x3b   : > { %v758_v54 = vrot.slane %v756_v22, 5  ;;  %1500 = vmatpush3.bf16.msra.mxu0 %v1050_v60  ;;  %v729_v37 = vsel %vm1700_vm6, %v724_v62, %v728_v58  ;;  %v734_v6 = vrot.slane %v733_v2, 4  ;;  %1511 = vmatprep.mubr.msk.bf16.mxu1 %vm496_vm5, %v1415_v16  ;;  %v1025_v12 = vshll.u32 %v366_v55, 16 }
  0x3c   : > { %v753_v9 = vor.u32 %v752_v21, %v1843_v27  ;;  %v744_v10 = vrot.slane %v743_v61, 4  ;;  %v1018_v46 = vrot.slane %v1016_v63, 4  ;;  %v1021_v3 = vrot.slane %v1019_v4, 5 }
  0x3d   : > { %v739_v15 = vsel %vm1700_vm6, %v734_v6, %v738_v33  ;;  %v1416_v17 = vcombine.low %v1750_v18, %v1766_v32  ;;  %v1406_v1 = vcombine.low %v1661_v7, %v1664_v8  ;;  %v1417_v16 = vcombine.low %v1852_v49, %v1862_v0 }
  0x3e   : > { %v754_v14 = vrot.slane %v753_v9, 4  ;;  %v1390_v19 = vcombine.low %v729_v37, %v739_v15  ;;  %v749_v27 = vsel %vm1700_vm6, %v744_v10, %v748_v45  ;;  %v1022_v25 = vor.u32 %v1021_v3, %v1018_v46 }
  0x3f   : > { %v1027_v30 = vrot.slane %v1025_v12, 5  ;;  %v1407_v7 = vcombine.low %v1669_v13, %v1709_v34  ;;  %v1408_v32 = vcombine.low %v1761_v31, %v1773_v36  ;;  %v1409_v49 = vcombine.low %v1788_v43, %v365_v44 }
  0x40   : > { %v759_v52 = vsel %vm1700_vm6, %v754_v14, %v758_v54  ;;  %1485 = vmatprep.mubr.msk.bf16.mxu0 %vm598_vm2, %v1390_v19  ;;  %v1023_v35 = vrot.slane %v1022_v25, 4 }
  0x41   : > { %v1391_v26 = vcombine.low %v749_v27, %v759_v52  ;;  %v1423_v27 = vld [vmem:[%s2006_s4] ss:$0 sm:$0xff] }
  0x42   : > { %1512 = vmatmul.mubr.msk.bf16.vlgmr.msra.gmra.mxu1 %vm496_vm5, %v1416_v17  ;;  %v1028_v18 = vsel %vm1700_vm6, %v1023_v35, %v1027_v30 }
  0x43   : > { %1486 = vmatmul.mubr.msk.bf16.gmra.mxu0 %vm598_vm2, %v1391_v26  ;;  %1515 = vmatprep.mubr.msk.bf16.mxu1 %vm496_vm5, %v1417_v16  ;;  %v1418_v8 = vcombine.low %v1870_v42, %v1028_v18 }
  0x44   : > { %1501 = vmatprep.mubr.msk.bf16.mxu0 %vm598_vm2, %v1406_v1 }
  0x4a   : > { %1516 = vmatmul.mubr.msk.bf16.gmra.mxu1 %vm496_vm5, %v1418_v8 }
  0x4b   : > { %1502 = vmatmul.mubr.msk.bf16.vlgmr.msra.gmra.mxu0 %vm598_vm2, %v1407_v7 }
  0x4c   : > { %1505 = vmatprep.mubr.msk.bf16.mxu0 %vm598_vm2, %v1408_v32 }
  0x53   : > { %1506 = vmatmul.mubr.msk.bf16.gmra.mxu0 %vm598_vm2, %v1409_v49 }
  0xd6   : > { %v1473_v29 = vpop.f32.mrf.mxu1 }
  0xd8   : > { %v649_v0 = vpop.f32.mrf.mxu1 }
  0xda   : > { %v1474_v47 = vpop.f32.mrf.mxu1 }
  0xdc   : > { %v652_v13 = vpop.f32.mrf.mxu1 }
  0xe3   : > { %v1463_v20 = vpop.f32.mrf.mxu0 }
  0xe4   : > { %v658_v22 = vadd.f32 %v1473_v29, %v1463_v20 }
  0xe5   : > { %v547_v34 = vpop.f32.mrf.mxu0 }
  0xe6   : > { %v650_v2 = vadd.f32 %v649_v0, %v547_v34 }
  0xe7   : > { %v1464_v48 = vpop.f32.mrf.mxu0 }
  0xe8   : > { %v661_v54 = vadd.f32 %v1474_v47, %v1464_v48 }
  0xe9   : > { %v1477_v42 = vpop.f32.mrf.mxu1  ;;  %v550_v36 = vpop.f32.mrf.mxu0 }
  0xea   : > { %v653_v37 = vadd.f32 %v652_v13, %v550_v36 }
  0xeb   : > { %v665_v28 = vpop.f32.mrf.mxu1 }
  0xed   : > { %v1478_v31 = vpop.f32.mrf.mxu1 }
  0xef   : > { %v668_v51 = vpop.f32.mrf.mxu1 }
  0xf2   : > { %v1467_v53 = vpop.f32.mrf.mxu0  ;;  %v1493_v38 = vpop.f32.mrf.mxu1 }
  0xf3   : > { %v674_v12 = vadd.f32 %v1477_v42, %v1467_v53 }
  0xf4   : > { %v563_v24 = vpop.f32.mrf.mxu0  ;;  %v976_v57 = vpop.f32.mrf.mxu1 }
  0xf5   : > { %v666_v17 = vadd.f32 %v665_v28, %v563_v24 }
  0xf6   : > { %v1468_v5 = vpop.f32.mrf.mxu0  ;;  %v1494_v43 = vpop.f32.mrf.mxu1 }
  0xf7   : > { %v677_v30 = vadd.f32 %v1478_v31, %v1468_v5 }
  0xf8   : > { %v566_v39 = vpop.f32.mrf.mxu0  ;;  %v979_v11 = vpop.f32.mrf.mxu1 }
  0xf9   : > { %v669_v29 = vadd.f32 %v668_v51, %v566_v39 }
  0xfa   : > { %v1483_v56 = vpop.f32.mrf.mxu0  ;;  %v1497_v50 = vpop.f32.mrf.mxu1 }
  0xfb   : > { %v907_v45 = vadd.f32 %v1483_v56, %v658_v22 }
  0xfc   : > { %v874_v41 = vpop.f32.mrf.mxu0  ;;  %v992_v58 = vpop.f32.mrf.mxu1 }
  0xfd   : > { %v905_v63 = vadd.f32 %v874_v41, %v650_v2  ;;  %v1009_v9 = vadd.f32 %v1493_v38, %v907_v45 }
  0xfe   : > { %v1484_v59 = vpop.f32.mrf.mxu0  ;;  %v1498_v23 = vpop.f32.mrf.mxu1 }
  0xff   : > { %v908_v6 = vadd.f32 %v1484_v59, %v661_v54  ;;  %v1007_v14 = vadd.f32 %v976_v57, %v905_v63 }
 0x100   : > { %v877_v44 = vpop.f32.mrf.mxu0  ;;  %v1965_v60 = vpop.f32.mrf.mxu1 }
 0x101   : > { %v906_v3 = vadd.f32 %v877_v44, %v653_v37  ;;  %v1010_v16 = vadd.f32 %v1494_v43, %v908_v6 }
 0x102   : > { %v1513_v40 = vpop.f32.mrf.mxu1 }
 0x103   : > { %v1487_v33 = vpop.f32.mrf.mxu0  ;;  %v1008_v49 = vadd.f32 %v979_v11, %v906_v3 }
 0x104   : > { %v1181_v62 = vpop.f32.mrf.mxu1  ;;  %v911_v19 = vadd.f32 %v1487_v33, %v674_v12 }
 0x105   : > { %v890_v55 = vpop.f32.mrf.mxu0 }
 0x106   : > { %v1514_v61 = vpop.f32.mrf.mxu1  ;;  %v909_v26 = vadd.f32 %v890_v55, %v666_v17  ;;  %v1013_v47 = vadd.f32 %v1497_v50, %v911_v19 }
 0x107   : > { %v1488_v21 = vpop.f32.mrf.mxu0 }
 0x108   : > { %v1184_v46 = vpop.f32.mrf.mxu1  ;;  %v912_v20 = vadd.f32 %v1488_v21, %v677_v30  ;;  %v1011_v31 = vadd.f32 %v992_v58, %v909_v26 }
 0x109   : > { %v893_v4 = vpop.f32.mrf.mxu0 }
 0x10a   : > { %v1517_v18 = vpop.f32.mrf.mxu1  ;;  %v910_v36 = vadd.f32 %v893_v4, %v669_v29  ;;  %v1014_v39 = vadd.f32 %v1498_v23, %v912_v20 }
 0x10b   : > { %v1503_v10 = vpop.f32.mrf.mxu0 }
 0x10c   : > { %v1119_v15 = vadd.f32 %v1503_v10, %v1009_v9  ;;  %v1197_v48 = vpop.f32.mrf.mxu1  ;;  %v1012_v59 = vadd.f32 %v1965_v60, %v910_v36 }
 0x10d   : > { %v1086_v25 = vpop.f32.mrf.mxu0 }
 0x10e   : > { %v1214_v52 = vadd.f32 %v1513_v40, %v1119_v15  ;;  %v1117_v1 = vadd.f32 %v1086_v25, %v1007_v14  ;;  %v1518_v11 = vpop.f32.mrf.mxu1 }
 0x10f   : > { %v1504_v35 = vpop.f32.mrf.mxu0 }
 0x110   : > { %v1229_v7 = vadd.f32 %v1423_v27, %v1214_v52  ;;  %v1212_v8 = vadd.f32 %v1181_v62, %v1117_v1  ;;  %v1120_v32 = vadd.f32 %v1504_v35, %v1010_v16  ;;  %v1200_v55 = vpop.f32.mrf.mxu1 }
 0x111   : > { %v1089_v0 = vpop.f32.mrf.mxu0 }
 0x112   : > { %1237 = vst.msk [vmem:[%s1974_s26 + $0x10] sm:$0xff] %vm598_vm2, %v1229_v7  ;;  %v1227_v13 = vadd.f32 %v1423_v27, %v1212_v8  ;;  %v1215_v34 = vadd.f32 %v1514_v61, %v1120_v32  ;;  %v1118_v42 = vadd.f32 %v1089_v0, %v1008_v49 }
 0x113   : > { %v1507_v28 = vpop.f32.mrf.mxu0 }
 0x114   : > { %1235 = vst.msk [vmem:[%s1974_s26] sm:$0xff] %vm598_vm2, %v1227_v13  ;;  %v1230_v53 = vadd.f32 %v1423_v27, %v1215_v34  ;;  %v1213_v38 = vadd.f32 %v1184_v46, %v1118_v42  ;;  %v1123_v51 = vadd.f32 %v1507_v28, %v1013_v47 }
 0x115   : > { %v1102_v24 = vpop.f32.mrf.mxu0 }
 0x116   : > { %1238 = vst.msk [vmem:[%s1974_s26 + $0x18] sm:$0xff] %vm598_vm2, %v1230_v53  ;;  %v1228_v57 = vadd.f32 %v1423_v27, %v1213_v38  ;;  %v1218_v5 = vadd.f32 %v1517_v18, %v1123_v51  ;;  %v1121_v43 = vadd.f32 %v1102_v24, %v1011_v31 }
 0x117   : > { %v1508_v56 = vpop.f32.mrf.mxu0 }
 0x118   : > { %1236 = vst.msk [vmem:[%s1974_s26 + $0x8] sm:$0xff] %vm598_vm2, %v1228_v57  ;;  %v1233_v50 = vadd.f32 %v1423_v27, %v1218_v5  ;;  %v1216_v41 = vadd.f32 %v1197_v48, %v1121_v43  ;;  %v1124_v58 = vadd.f32 %v1508_v56, %v1014_v39 }
 0x119   : > { %v1105_v44 = vpop.f32.mrf.mxu0 }
 0x11a   : > { %1241 = vst.msk [vmem:[%s1974_s26 + $0x30] sm:$0xff] %vm598_vm2, %v1233_v50  ;;  %v1231_v33 = vadd.f32 %v1423_v27, %v1216_v41  ;;  %v1219_v40 = vadd.f32 %v1518_v11, %v1124_v58  ;;  %v1122_v22 = vadd.f32 %v1105_v44, %v1012_v59 }
 0x11c   : > { %1239 = vst.msk [vmem:[%s1974_s26 + $0x20] sm:$0xff] %vm598_vm2, %v1231_v33  ;;  %v1234_v23 = vadd.f32 %v1423_v27, %v1219_v40  ;;  %v1217_v62 = vadd.f32 %v1200_v55, %v1122_v22 }
 0x11e   : > { %1242 = vst.msk [vmem:[%s1974_s26 + $0x38] sm:$0xff] %vm598_vm2, %v1234_v23  ;;  %v1232_v2 = vadd.f32 %v1423_v27, %v1217_v62 }
 0x120   : > { %1240 = vst.msk [vmem:[%s1974_s26 + $0x28] sm:$0xff] %vm598_vm2, %v1232_v2 }
 0x121 PF: > { %s15_s20 = sadd.s32 1, %s1581_s20   ;;  %s2012_s18 = smov %s1577_s19 }
 0x122   : > { %p12_p5 = scmp.ge.s32.totalorder %s15_s20, 4   ;;  %s2013_s19 = smov %s2015_s21 }
 0x124   :  { %14 = sbr.rel (!%p12_p5) target bundleno = 2 (0x2), region = 77 }

</bundles_post_ra>
